<compile_context>
chip_gen: v7x
topology: tpu7x:2x2x1
jax: 0.10.0
libtpu: 0.0.40
codegen_flags: <defaults>
</compile_context>

<pallas_src>
import functools
import math

import jax
import jax.numpy as jnp
from jax.experimental import pallas as pl
from jax.experimental.pallas import tpu as pltpu


def _round_up(x, m):
    return ((x + m - 1) // m) * m


def _pick_tile_b(bp, tile_b):
    """Largest multiple-of-8 divisor of bp that is <= tile_b, preferring one
    that yields >= 2 grid steps (so v7x's second TensorCore gets work)."""
    t = max(8, min(int(tile_b), bp))
    t -= t % 8
    first = None
    for tb in range(t, 7, -8):
        if bp % tb == 0:
            if first is None:
                first = tb
            if bp // tb >= 2:
                return tb
    return first if first is not None else 8


def _pick_tile_h(hp, tile_h):
    """Largest multiple-of-128 divisor of hp that is <= tile_h."""
    t = max(128, min(int(tile_h), hp))
    t -= t % 128
    for th in range(t, 127, -128):
        if hp % th == 0:
            return th
    return 128


def _gp_forward_kernel(x_ref, wT_ref, b_ref, betaT_ref, logits_ref, phi_ref,
                       acc_ref, *, c):
    # x_ref:      (TB, D_in)  VMEM  batch tile (revisited across h; no re-DMA)
    # wT_ref:     (D_in, TH)  VMEM  W.T hidden-chunk (streamed, pre-cast)
    # b_ref:      (1, TH)     VMEM  bias chunk (f32)
    # betaT_ref:  (TH, Op)    VMEM  beta.T hidden-chunk (streamed, pre-cast)
    # logits_ref: (TB, Op)    VMEM out (resident across h)
    # phi_ref:    (TB, TH)    VMEM out (per-chunk)
    # acc_ref:    (TB, Op)    VMEM f32 scratch (logits accumulator)
    h = pl.program_id(1)

    @pl.when(h == 0)
    def _():
        acc_ref[...] = jnp.zeros_like(acc_ref)

    # Hidden pre-activation chunk on the MXU: z = b - x @ W.T  (f32 accum).
    x = x_ref[...].astype(wT_ref.dtype)
    z = b_ref[...] - jnp.dot(x, wT_ref[...], preferred_element_type=jnp.float32)

    # Random-feature map in f32 (VPU/EUP): Phi = C * cos(z).
    phi = c * jnp.cos(z)
    phi_ref[...] = phi.astype(phi_ref.dtype)

    # Accumulate logits chunk on the MXU: acc += Phi_chunk @ beta.T_chunk.
    acc_ref[...] += jnp.dot(phi.astype(betaT_ref.dtype), betaT_ref[...],
                            preferred_element_type=jnp.float32)

    @pl.when(h == pl.num_programs(1) - 1)
    def _():
        logits_ref[...] = acc_ref[...].astype(logits_ref.dtype)


def gp_prepare(W, b, beta, *, matmul_dtype=jnp.float32):
    """One-time weight preparation (do this at model init, NOT per forward).

    Pads hidden/output dims to multiples of 128, transposes to the layouts the
    kernel consumes, and casts the matmul operands to `matmul_dtype`
    (jnp.bfloat16 is the MXU fast path on v5e/v6e/v7x; f32 matches the
    reference to ~1e-5).  The bias stays f32 (added post-matmul in f32).
    """
    H, D_in = W.shape
    O = beta.shape[0]
    Hp = _round_up(H, 128)
    Op = _round_up(O, 128)
    wT_p = jnp.zeros((D_in, Hp), matmul_dtype).at[:, :H].set(
        W.T.astype(matmul_dtype))
    b_p = jnp.zeros((1, Hp), jnp.float32).at[0, :H].set(b.astype(jnp.float32))
    betaT_p = jnp.zeros((Hp, Op), matmul_dtype).at[:H, :O].set(
        beta.T.astype(matmul_dtype))
    return wT_p, b_p, betaT_p


@functools.partial(
    jax.jit,
    static_argnames=("hidden_size", "output_size", "scale", "tile_b", "tile_h",
                     "phi_dtype"))
def gp_forward(inputs, wT_p, b_p, betaT_p, *, hidden_size, output_size,
               scale=2.0, tile_b=256, tile_h=512, phi_dtype=jnp.float32):
    """Pallas implementation of GP.forward.

    inputs:  (B, input_size) f32
    wT_p/b_p/betaT_p: outputs of gp_prepare() (padded / transposed / cast).
    Returns (logits (B, output_size) f32, Phi (B, hidden_size) phi_dtype).
    """
    B, D_in = inputs.shape
    Hp = wT_p.shape[1]
    Op = betaT_p.shape[1]
    H, O = hidden_size, output_size
    c = float(math.sqrt(scale / H))

    # Batch: pad only to a multiple of 8; tile with a divisor of the padded
    # batch (no dead-row over-padding), preferring >=2 grid steps for megacore.
    Bp = _round_up(B, 8)
    TB = _pick_tile_b(Bp, tile_b)
    # Hidden: stream in chunks of TH (multiple of 128 dividing Hp).
    TH = _pick_tile_h(Hp, tile_h)

    x_p = inputs if Bp == B else (
        jnp.zeros((Bp, D_in), inputs.dtype).at[:B, :].set(inputs))

    # VMEM budget: double-buffered streamed tiles + accumulator + headroom,
    # capped generation-aware (v7x has only 64 MiB physical VMEM).
    esz_mm = jnp.dtype(wT_p.dtype).itemsize
    esz_phi = jnp.dtype(phi_dtype).itemsize
    per_step = (TB * D_in * 4 + D_in * TH * esz_mm + TH * 4
                + TH * Op * esz_mm + TB * TH * esz_phi + TB * Op * 4)
    needed = 2 * per_step + TB * Op * 4 + (2 << 20)
    try:
        vmem_cap = int(pltpu.get_tpu_info().vmem_capacity_bytes)
    except Exception:  # pragma: no cover - conservative fallback
        vmem_cap = 64 << 20
    vmem_limit = max(4 << 20, min(needed, (vmem_cap * 3) // 4))

    kernel = functools.partial(_gp_forward_kernel, c=c)

    out_shapes = (
        jax.ShapeDtypeStruct((Bp, Op), jnp.float32),   # logits (padded)
        jax.ShapeDtypeStruct((Bp, Hp), phi_dtype),     # Phi    (padded)
    )

    logits_p, phi_p = pl.pallas_call(
        kernel,
        out_shape=out_shapes,
        grid_spec=pltpu.PrefetchScalarGridSpec(
            num_scalar_prefetch=0,
            grid=(Bp // TB, Hp // TH),
            in_specs=[
                pl.BlockSpec((TB, D_in), lambda i, h: (i, 0)),   # x tile
                pl.BlockSpec((D_in, TH), lambda i, h: (0, h)),   # W.T chunk
                pl.BlockSpec((1, TH), lambda i, h: (0, h)),      # bias chunk
                pl.BlockSpec((TH, Op), lambda i, h: (h, 0)),     # beta.T chunk
            ],
            out_specs=[
                pl.BlockSpec((TB, Op), lambda i, h: (i, 0)),     # logits tile
                pl.BlockSpec((TB, TH), lambda i, h: (i, h)),     # Phi chunk
            ],
            scratch_shapes=[pltpu.VMEM((TB, Op), jnp.float32)],  # logits acc
        ),
        compiler_params=pltpu.CompilerParams(
            dimension_semantics=("parallel", "arbitrary"),
            vmem_limit_bytes=vmem_limit,
        ),
    )(x_p, wT_p, b_p, betaT_p)

    # Slice away batch / lane padding.
    return logits_p[:B, :O], phi_p[:B, :H]


def gp_forward_ref(inputs, W, b, beta, scale=2.0):
    """Pure-JAX reference matching the PyTorch module's forward()."""
    H = W.shape[0]
    C = math.sqrt(scale / H)
    phi = C * jnp.cos(inputs @ (-W).T + b)
    logits = phi @ beta.T
    return logits, phi


if __name__ == "__main__":
    # Deterministic parameter/input construction (matches __init__ shapes):
    #   W    ~ N(0, 1),        shape (hidden, input)
    #   b    ~ U(0, 2*pi),     shape (hidden,)
    #   beta ~ N(0, I),        shape (output, hidden)
    input_size, hidden_size, output_size = 32, 64, 8
    batch = 8
    scale = 2.0

    key = jax.random.PRNGKey(0)
    k_w, k_b, k_beta, k_x = jax.random.split(key, 4)

    W = jax.random.normal(k_w, (hidden_size, input_size), dtype=jnp.float32)
    b = 2.0 * jnp.pi * jax.random.uniform(k_b, (hidden_size,), dtype=jnp.float32)
    beta = jax.random.normal(k_beta, (output_size, hidden_size), dtype=jnp.float32)
    x = jax.random.normal(k_x, (batch, input_size), dtype=jnp.float32)

    # One-time weight preparation (hoisted out of the per-call path).
    wT_p, b_p, betaT_p = gp_prepare(W, b, beta)                 # f32 operands
    logits, phi = gp_forward(x, wT_p, b_p, betaT_p,
                             hidden_size=hidden_size, output_size=output_size,
                             scale=scale)
    jax.block_until_ready((logits, phi))

    logits_ref, phi_ref = gp_forward_ref(x, W, b, beta, scale=scale)
    assert logits.shape == (batch, output_size)
    assert phi.shape == (batch, hidden_size)
    assert jnp.allclose(logits, logits_ref, atol=1e-4, rtol=1e-4)
    assert jnp.allclose(phi, phi_ref, atol=1e-5, rtol=1e-5)

    # bf16 MXU-operand path (fast path on v5e/v6e/v7x; f32 accumulation, f32
    # cos) with bf16 Phi writeback: throughput path, loose tolerance since the
    # bf16-rounded pre-activation feeds cos().
    wT_bf, b_bf, betaT_bf = gp_prepare(W, b, beta, matmul_dtype=jnp.bfloat16)
    logits_bf, phi_bf = gp_forward(x, wT_bf, b_bf, betaT_bf,
                                   hidden_size=hidden_size,
                                   output_size=output_size, scale=scale,
                                   phi_dtype=jnp.bfloat16)
    jax.block_until_ready((logits_bf, phi_bf))
    assert jnp.all(jnp.isfinite(logits_bf)) and jnp.all(jnp.isfinite(phi_bf))
    assert jnp.allclose(logits_bf, logits_ref, atol=0.5, rtol=0.5)

    print("KERNEL_OK")
</pallas_src>

<mosaic_0001>
module attributes {stable_mosaic.version = 11 : i64} {
  func.func @_gp_forward_kernel(%arg0: i32, %arg1: i32, %arg2: memref<8x32xf32, #tpu.memory_space<vmem>>, %arg3: memref<32x128xf32, #tpu.memory_space<vmem>>, %arg4: memref<1x128xf32, #tpu.memory_space<vmem>>, %arg5: memref<128x128xf32, #tpu.memory_space<vmem>>, %arg6: memref<8x128xf32, #tpu.memory_space<vmem>>, %arg7: memref<8x128xf32, #tpu.memory_space<vmem>>, %arg8: memref<8x128xf32, #tpu.memory_space<vmem>>) attributes {dimension_semantics = [#tpu.dimension_semantics<parallel>, #tpu.dimension_semantics<arbitrary>], iteration_bounds = array<i64: 1, 1>, scalar_prefetch = 0 : i64, scratch_operands = 1 : i64, tpu.core_type = #tpu.core_type<tc>, window_params = [{transform_indices = @transform_0, window_bounds = array<i64: 8, 32>}, {transform_indices = @transform_1, window_bounds = array<i64: 32, 128>}, {transform_indices = @transform_2, window_bounds = array<i64: 1, 128>}, {transform_indices = @transform_3, window_bounds = array<i64: 128, 128>}, {transform_indices = @transform_4, window_bounds = array<i64: 8, 128>}, {transform_indices = @transform_5, window_bounds = array<i64: 8, 128>}]} {
    %c0_i32 = arith.constant 0 : i32
    %0 = arith.cmpi eq, %arg1, %c0_i32 : i32
    %1 = arith.extui %0 : i1 to i32
    %c0_i32_0 = arith.constant 0 : i32
    %2 = arith.cmpi ne, %1, %c0_i32_0 : i32
    scf.if %2 {
      %cst_18 = arith.constant 0.000000e+00 : f32
      %21 = vector.broadcast %cst_18 : f32 to vector<8x128xf32>
      %c0_19 = arith.constant 0 : index
      %c0_20 = arith.constant 0 : index
      %22 = vector.load %arg8[%c0_19, %c0_20] : memref<8x128xf32, #tpu.memory_space<vmem>>, vector<8x128xf32>
      tpu.vector_store %arg8[%c0_19, %c0_20], %21 {strides = array<i32>} : memref<8x128xf32, #tpu.memory_space<vmem>>, vector<8x128xf32>,
    } else {
    }
    %c0 = arith.constant 0 : index
    %c0_1 = arith.constant 0 : index
    %3 = vector.load %arg2[%c0, %c0_1] : memref<8x32xf32, #tpu.memory_space<vmem>>, vector<8x32xf32>
    %c0_2 = arith.constant 0 : index
    %c0_3 = arith.constant 0 : index
    %4 = vector.load %arg4[%c0_2, %c0_3] : memref<1x128xf32, #tpu.memory_space<vmem>>, vector<1x128xf32>
    %c0_4 = arith.constant 0 : index
    %c0_5 = arith.constant 0 : index
    %5 = vector.load %arg3[%c0_4, %c0_5] : memref<32x128xf32, #tpu.memory_space<vmem>>, vector<32x128xf32>
    %cst = arith.constant dense<0.000000e+00> : vector<8x128xf32>
    %6 = tpu.matmul %3, %5, %cst {dimension_numbers = #tpu.dot_dimension_numbers<[1], [0], [0], [1], [0, 0, 1, 1], [], []>} : vector<8x32xf32>, vector<32x128xf32>, vector<8x128xf32> -> vector<8x128xf32>
    %7 = vector.broadcast %4 : vector<1x128xf32> to vector<8x128xf32>
    %8 = arith.subf %7, %6 : vector<8x128xf32>
    %9 = math.cos %8 : vector<8x128xf32>
    %cst_6 = arith.constant 0.176776692 : f32
    %10 = vector.broadcast %cst_6 : f32 to vector<8x128xf32>
    %11 = arith.mulf %10, %9 : vector<8x128xf32>
    %c0_7 = arith.constant 0 : index
    %c0_8 = arith.constant 0 : index
    %12 = vector.load %arg7[%c0_7, %c0_8] : memref<8x128xf32, #tpu.memory_space<vmem>>, vector<8x128xf32>
    tpu.vector_store %arg7[%c0_7, %c0_8], %11 {strides = array<i32>} : memref<8x128xf32, #tpu.memory_space<vmem>>, vector<8x128xf32>,
    %c0_9 = arith.constant 0 : index
    %c0_10 = arith.constant 0 : index
    %13 = vector.load %arg8[%c0_9, %c0_10] : memref<8x128xf32, #tpu.memory_space<vmem>>, vector<8x128xf32>
    %c0_11 = arith.constant 0 : index
    %c0_12 = arith.constant 0 : index
    %14 = vector.load %arg5[%c0_11, %c0_12] : memref<128x128xf32, #tpu.memory_space<vmem>>, vector<128x128xf32>
    %cst_13 = arith.constant dense<0.000000e+00> : vector<8x128xf32>
    %15 = tpu.matmul %11, %14, %cst_13 {dimension_numbers = #tpu.dot_dimension_numbers<[1], [0], [0], [1], [0, 0, 1, 1], [], []>} : vector<8x128xf32>, vector<128x128xf32>, vector<8x128xf32> -> vector<8x128xf32>
    %16 = arith.addf %13, %15 : vector<8x128xf32>
    %c0_14 = arith.constant 0 : index
    %c0_15 = arith.constant 0 : index
    %17 = vector.load %arg8[%c0_14, %c0_15] : memref<8x128xf32, #tpu.memory_space<vmem>>, vector<8x128xf32>
    tpu.vector_store %arg8[%c0_14, %c0_15], %16 {strides = array<i32>} : memref<8x128xf32, #tpu.memory_space<vmem>>, vector<8x128xf32>,
    %c0_i32_16 = arith.constant 0 : i32
    %18 = arith.cmpi eq, %arg1, %c0_i32_16 : i32
    %19 = arith.extui %18 : i1 to i32
    %c0_i32_17 = arith.constant 0 : i32
    %20 = arith.cmpi ne, %19, %c0_i32_17 : i32
    scf.if %20 {
      %c0_18 = arith.constant 0 : index
      %c0_19 = arith.constant 0 : index
      %21 = vector.load %arg8[%c0_18, %c0_19] : memref<8x128xf32, #tpu.memory_space<vmem>>, vector<8x128xf32>
      %c0_20 = arith.constant 0 : index
      %c0_21 = arith.constant 0 : index
      %22 = vector.load %arg6[%c0_20, %c0_21] : memref<8x128xf32, #tpu.memory_space<vmem>>, vector<8x128xf32>
      tpu.vector_store %arg6[%c0_20, %c0_21], %21 {strides = array<i32>} : memref<8x128xf32, #tpu.memory_space<vmem>>, vector<8x128xf32>,
    } else {
    }
    return
  }
  func.func @transform_0(%arg0: i32, %arg1: i32) -> (i32, i32) {
    %c0_i32 = arith.constant 0 : i32
    %c0_i32_0 = arith.constant 0 : i32
    return %arg0, %c0_i32 : i32, i32
  }
  func.func @transform_1(%arg0: i32, %arg1: i32) -> (i32, i32) {
    %c0_i32 = arith.constant 0 : i32
    %c0_i32_0 = arith.constant 0 : i32
    return %c0_i32, %arg1 : i32, i32
  }
  func.func @transform_2(%arg0: i32, %arg1: i32) -> (i32, i32) {
    %c0_i32 = arith.constant 0 : i32
    %c0_i32_0 = arith.constant 0 : i32
    return %c0_i32, %arg1 : i32, i32
  }
  func.func @transform_3(%arg0: i32, %arg1: i32) -> (i32, i32) {
    %c0_i32 = arith.constant 0 : i32
    %c0_i32_0 = arith.constant 0 : i32
    return %arg1, %c0_i32 : i32, i32
  }
  func.func @transform_4(%arg0: i32, %arg1: i32) -> (i32, i32) {
    %c0_i32 = arith.constant 0 : i32
    %c0_i32_0 = arith.constant 0 : i32
    return %arg0, %c0_i32 : i32, i32
  }
  func.func @transform_5(%arg0: i32, %arg1: i32) -> (i32, i32) {
    %c0_i32 = arith.constant 0 : i32
    return %arg0, %arg1 : i32, i32
  }
}

</mosaic_0001>

<bundles_post_ra>
// kernel: gp_forward.1
= control target key start
LH: loop header
LB: loop body
LE: loop exit
PB: predicated region body
PF: predicated region fallthrough
CT: control target
= control target key end

     0   :  { %11 = vsyncpa [#allocation4], 0  ;;  %s763_s0 = inlined_call_operand.hbm [shape: f32[8,32], index: 0, kind: input, shape index: {}]   ;;  %s764_s1 = inlined_call_operand.hbm [shape: f32[32,128], index: 1, kind: input, shape index: {}]   ;;  %s765_s2 = inlined_call_operand.vmem [shape: f32[1,128], index: 2, kind: input, shape index: {}]   ;;  %s766_s3 = inlined_call_operand.hbm [shape: f32[128,128], index: 3, kind: input, shape index: {}]   ;;  %s767_s4 = inlined_call_operand.hbm [shape: f32[8,128], index: 4, kind: output, shape index: {0}]   ;;  %s768_s5 = inlined_call_operand.hbm [shape: f32[8,128], index: 5, kind: output, shape index: {1}]  }
   0x1   :  { %12 = vsyncpa [#allocation7], 0 }
   0x2   :  { %13 = vsyncpa [#allocation5], 0 }
   0x3   :  { %14 = vsyncpa [#allocation11], 0  ;;  %s627_s18 = smov [#allocation6]   ;;  %s509_s22 = scalar_lea.hbm %s764_s1, 512 }
   0x4   :  { %s30_s19 = sshll.u32 %s627_s18, 4  ;;  %p510_p0 = scmp.ne.s32.totalorder %s764_s1, %s509_s22  ;;  %s31_s19 = int_to_ptr.vmem [resolvable:$true] %s30_s19 }
   0x5   :  { %p513_p1 = scmp.lt.u32.totalorder %s509_s22, %s764_s1 }
   0x7   :  { %p515_p2 = pnand %p513_p1, %p510_p0 }
   0x9   :  { %518 = shalt.err (!%p515_p2)
}
   0xa   :  { %s519_s27 = scalar_lea.vmem %s31_s19, 512  ;;  %p524_p4 = scmp.lt.s32.totalorder %s31_s19, %s31_s19 }
   0xb   :  { %p520_p3 = scmp.ne.s32.totalorder %s31_s19, %s519_s27  ;;  %p525_p5 = scmp.lt.s32.totalorder %s519_s27, %s519_s27 }
   0xd   :  { %p526_p6 = por %p525_p5, %p524_p4 }
   0xf   :  { %p527_p7 = pnand %p526_p6, %p520_p3 }
  0x11   :  { %530 = shalt.err (!%p527_p7)
}
  0x12   :  { %s628_s28 = smov 128   ;;  %s629_s29 = smov 8  }
  0x13   :  { %36 = dma.hbm_to_vmem [thread:$0]  %s764_s1, 512, %s31_s19, [#allocation7], %s628_s28, %s628_s28, %s629_s29  }
  0x14   :  { %s630_s7 = smov [#allocation3]   ;;  %s631_s9 = smov [#allocation8]  }
  0x15   :  { %s21_s8 = sshll.u32 %s630_s7, 4  ;;  %s44_s10 = sshll.u32 %s631_s9, 4  ;;  %s22_s8 = int_to_ptr.vmem [resolvable:$true] %s21_s8  ;;  %s45_s10 = int_to_ptr.vmem [resolvable:$true] %s44_s10 }
  0x16   :  { %s531_s13 = scalar_lea.hbm %s763_s0, 128 }
  0x17   :  { %p532_p8 = scmp.ne.s32.totalorder %s763_s0, %s531_s13  ;;  %p535_p9 = scmp.lt.u32.totalorder %s531_s13, %s763_s0 }
  0x19   :  { %p537_p10 = pnand %p535_p9, %p532_p8 }
  0x1b   :  { %540 = shalt.err (!%p537_p10)
}
  0x1c   :  { %s541_s1 = scalar_lea.vmem %s22_s8, 128  ;;  %p546_p12 = scmp.lt.s32.totalorder %s22_s8, %s22_s8 }
  0x1d   :  { %p542_p11 = scmp.ne.s32.totalorder %s22_s8, %s541_s1  ;;  %p547_p13 = scmp.lt.s32.totalorder %s541_s1, %s541_s1 }
  0x1f   :  { %p548_p0 = por %p547_p13, %p546_p12 }
  0x21   :  { %p549_p1 = pnand %p548_p0, %p542_p11 }
  0x23   :  { %552 = shalt.err (!%p549_p1)
}
  0x24   :  { %24 = dma.hbm_to_vmem [thread:$0]  %s763_s0, 128, %s22_s8, [#allocation4]  }
  0x25   :  { %s553_s22 = scalar_lea.hbm %s766_s3, 2048 }
  0x26   :  { %p554_p2 = scmp.ne.s32.totalorder %s766_s3, %s553_s22  ;;  %p557_p3 = scmp.lt.u32.totalorder %s553_s22, %s766_s3 }
  0x28   :  { %p559_p4 = pnand %p557_p3, %p554_p2 }
  0x2a   :  { %562 = shalt.err (!%p559_p4)
}
  0x2b   :  { %s563_s27 = scalar_lea.vmem %s45_s10, 2048  ;;  %p568_p6 = scmp.lt.s32.totalorder %s45_s10, %s45_s10 }
  0x2c   :  { %p564_p5 = scmp.ne.s32.totalorder %s45_s10, %s563_s27  ;;  %p569_p7 = scmp.lt.s32.totalorder %s563_s27, %s563_s27 }
  0x2e   :  { %p570_p8 = por %p569_p7, %p568_p6 }
  0x30   :  { %p571_p9 = pnand %p570_p8, %p564_p5 }
  0x32   :  { %574 = shalt.err (!%p571_p9)
}
  0x33   :  { %50 = dma.hbm_to_vmem [thread:$0]  %s766_s3, 2048, %s45_s10, [#allocation7], %s628_s28, %s628_s28, %s629_s29  }
  0x34   :  { %619 = dma.done.wait [#allocation4], 128  }
  0x35   :  { %620 = vsyncadd [#allocation4], 4294967168 }
  0x36   :  { %621 = dma.done.wait [#allocation7], 2560  }
  0x37   :  { %622 = vsyncadd [#allocation7], 4294964736  ;;  %v632_v0 = vmov 0.0|0.0   ;;  %vm633_vm0 = vmmov 0   ;;  %v634_v1 = vmov 0.0   ;;  %v67_v2 = vld [vmem:[#allocation6] sm:$0xff] }
  0x38   :  { %455 = vmatprep.subr.bf16.mxu0 %v632_v0  ;;  %417 = vmatprep.mubr.msk.f32.mxu0 %vm633_vm0, %v634_v1  ;;  %v68_v3 = vld [vmem:[#allocation6 + $0x8] sm:$0xff]  ;;  %v69_v4 = vld [vmem:[#allocation6 + $0x10] sm:$0xff]  ;;  %v70_v6 = vld [vmem:[#allocation6 + $0x18] sm:$0xff]  ;;  %vm71_vm1 = vcmask 261120   ;;  %v635_v47 = vmov 683565275  }
  0x39   :  { %461 = vmatprep.subr.bf16.mxu1 %v632_v0  ;;  %452 = vmatprep.mubr.msk.f32.mxu1 %vm633_vm0, %v634_v1  ;;  %v456_v5 = vpack.c.bf16 %v68_v3, %v67_v2  ;;  %v459_v7 = vpack.c.bf16 %v70_v6, %v69_v4  ;;  %v65_v8 = vld [vmem:[#allocation3] sm:$0xff]  ;;  %v258_v9 = vld [vmem:[#allocation8] sm:$0xff]  ;;  %v259_v10 = vld [vmem:[#allocation8 + $0x8] sm:$0xff]  ;;  %v636_v49 = vmov 2475754826  }
  0x3a   :  { %v462_v11 = vpack.c.bf16 %v259_v10, %v258_v9  ;;  %v260_v12 = vld [vmem:[#allocation8 + $0x10] sm:$0xff]  ;;  %v261_v13 = vld [vmem:[#allocation8 + $0x18] sm:$0xff]  ;;  %v262_v15 = vld [vmem:[#allocation8 + $0x20] sm:$0xff]  ;;  %v637_v52 = vmov 2131351028  }
  0x3b   :  { %457 = vmatpush3.bf16.msra.mxu0 %v456_v5  ;;  %v465_v14 = vpack.c.bf16 %v261_v13, %v260_v12  ;;  %v263_v16 = vld [vmem:[#allocation8 + $0x28] sm:$0xff]  ;;  %v264_v18 = vld [vmem:[#allocation8 + $0x30] sm:$0xff]  ;;  %v265_v19 = vld [vmem:[#allocation8 + $0x38] sm:$0xff]  ;;  %v638_v55 = vmov 2102212464  }
  0x3c   :  { %458 = vmatprep.subr.bf16.mxu0 %v632_v0  ;;  %463 = vmatpush3.bf16.msra.mxu1 %v462_v11  ;;  %v468_v17 = vpack.c.bf16 %v263_v16, %v262_v15  ;;  %v471_v20 = vpack.c.bf16 %v265_v19, %v264_v18  ;;  %v266_v21 = vld [vmem:[#allocation8 + $0x40] sm:$0xff]  ;;  %v267_v22 = vld [vmem:[#allocation8 + $0x48] sm:$0xff]  ;;  %v268_v24 = vld [vmem:[#allocation8 + $0x50] sm:$0xff]  ;;  %v639_v58 = vmov 920167782  }
  0x3d   :  { %464 = vmatprep.subr.bf16.mxu1 %v632_v0  ;;  %v474_v23 = vpack.c.bf16 %v267_v22, %v266_v21  ;;  %v269_v25 = vld [vmem:[#allocation8 + $0x58] sm:$0xff]  ;;  %v270_v27 = vld [vmem:[#allocation8 + $0x60] sm:$0xff]  ;;  %v271_v28 = vld [vmem:[#allocation8 + $0x68] sm:$0xff]  ;;  %v640_v61 = vmov 1326507024  }
  0x3e   :  { %v477_v26 = vpack.c.bf16 %v269_v25, %v268_v24  ;;  %v480_v29 = vpack.c.bf16 %v271_v28, %v270_v27  ;;  %v272_v30 = vld [vmem:[#allocation8 + $0x70] sm:$0xff]  ;;  %v273_v31 = vld [vmem:[#allocation8 + $0x78] sm:$0xff] }
  0x3f   :  { %460 = vmatpush3.bf16.msra.mxu0 %v459_v7  ;;  %v483_v32 = vpack.c.bf16 %v273_v31, %v272_v30  ;;  %v382_v33 = vld [vmem:[%s765_s2] ss:$0 sm:$0xff]  ;;  %s641_s2 = smov [#allocation10]  }
  0x40   :  { %466 = vmatpush3.bf16.msra.mxu1 %v465_v14  ;;  %s367_s29 = sshll.u32 %s641_s2, 4  ;;  %s368_s29 = int_to_ptr.vmem [resolvable:$true] %s367_s29 }
  0x41   :  { %467 = vmatprep.subr.bf16.mxu1 %v632_v0  ;;  %s575_s6 = scalar_lea.vmem %s368_s29, 128  ;;  %p580_p11 = scmp.lt.s32.totalorder %s368_s29, %s368_s29 }
  0x42   :  { %418 = vmatmul.mubr.msk.f32.vlgmr.msra.gmra.mrb[0].mxu0 %vm71_vm1, %v65_v8  ;;  %p576_p10 = scmp.ne.s32.totalorder %s368_s29, %s575_s6  ;;  %p581_p12 = scmp.lt.s32.totalorder %s575_s6, %s575_s6 }
  0x44   :  { %469 = vmatpush3.bf16.msra.mxu1 %v468_v17  ;;  %p582_p13 = por %p581_p12, %p580_p11 }
  0x45   :  { %470 = vmatprep.subr.bf16.mxu1 %v632_v0 }
  0x46   :  { %p583_p0 = pnand %p582_p13, %p576_p10 }
  0x48   :  { %472 = vmatpush3.bf16.msra.mxu1 %v471_v20 }
  0x49   :  { %473 = vmatprep.subr.bf16.mxu1 %v632_v0 }
  0x4c   :  { %475 = vmatpush3.bf16.msra.mxu1 %v474_v23 }
  0x4d   :  { %476 = vmatprep.subr.bf16.mxu1 %v632_v0 }
  0x50   :  { %478 = vmatpush3.bf16.msra.mxu1 %v477_v26 }
  0x51   :  { %479 = vmatprep.subr.bf16.mxu1 %v632_v0 }
  0x54   :  { %481 = vmatpush3.bf16.msra.mxu1 %v480_v29 }
  0x55   :  { %482 = vmatprep.subr.bf16.mxu1 %v632_v0 }
  0x58   :  { %484 = vmatpush3.bf16.msra.mxu1 %v483_v32 }
 0x115   :  { %v141_v34 = vpop.f32.mrb[0].mxu0 }
 0x116   :  { %v718_v35 = vsub.f32 %v382_v33, %v141_v34  ;;  %v419_v36 = vpop.f32.mrb[1].mxu0 }
 0x118   :  { %v155_v37 = vand.u32 2139095040, %v718_v35  ;;  %v152_v41 = vand.u32 2147483647, %v718_v35  ;;  %vm154_vm9 = vcmp.lt.s32.totalorder %v718_v35, 0  ;;  %vm244_vm14 = vweird.f32 %v718_v35 }
 0x11a   :  { %v156_v38 = vshrl.u32 %v155_v37, 23  ;;  %v159_v44 = vand.u32 8388607, %v152_v41  ;;  %vm153_vm10 = vcmp.le.f32.partialorder %v152_v41, 0.7853982 }
 0x11c   :  { %v383_v39 = vadd.s32 4294967169, %v156_v38  ;;  %v160_v63 = vor.u32 8388608, %v159_v44 }
 0x11e   :  { %v162_v40 = vadd.s32 1, %v383_v39  ;;  %v200_v13 = vshll.u32 %v160_v63, 8 }
 0x120   :  { %vm163_vm2 = vcmp.gt.s32.totalorder %v162_v40, 0 }
 0x121   :  { %v164_v42 = vsel %vm163_vm2, %v162_v40, 0 }
 0x122   :  { %v166_v43 = vand.u32 31, %v164_v42  ;;  %v165_v46 = vshrl.u32 %v164_v42, 5 }
 0x124   :  { %v167_v45 = vsub.s32 32, %v166_v43  ;;  %v169_v48 = vshll.u32 %v635_v47, %v166_v43  ;;  %v172_v50 = vshll.u32 %v636_v49, %v166_v43  ;;  %v175_v54 = vshll.u32 %v637_v52, %v166_v43 }
 0x125   :  { %v178_v57 = vshll.u32 %v638_v55, %v166_v43  ;;  %v181_v60 = vshll.u32 %v639_v58, %v166_v43  ;;  %vm184_vm3 = vcmp.lt.s32.totalorder %v165_v46, 1  ;;  %vm187_vm4 = vcmp.lt.s32.totalorder %v165_v46, 4 }
 0x126   :  { %v170_v51 = vshrl.u32 %v636_v49, %v167_v45  ;;  %v173_v53 = vshrl.u32 %v637_v52, %v167_v45  ;;  %v176_v56 = vshrl.u32 %v638_v55, %v167_v45  ;;  %v179_v59 = vshrl.u32 %v639_v58, %v167_v45 }
 0x127   :  { %v182_v62 = vshrl.u32 %v640_v61, %v167_v45  ;;  %v168_v8 = vshrl.u32 %v635_v47, %v167_v45  ;;  %vm186_vm5 = vcmp.lt.s32.totalorder %v165_v46, 3  ;;  %vm185_vm6 = vcmp.lt.s32.totalorder %v165_v46, 2 }
 0x128   :  { %v171_v0 = vor.u32 %v170_v51, %v169_v48  ;;  %v174_v1 = vor.u32 %v173_v53, %v172_v50  ;;  %v177_v2 = vor.u32 %v176_v56, %v175_v54  ;;  %v180_v3 = vor.u32 %v179_v59, %v178_v57 }
 0x129   :  { %v183_v4 = vor.u32 %v182_v62, %v181_v60 }
 0x12a   :  { %v189_v5 = vsel %vm187_vm4, %v177_v2, 2102212464  ;;  %v192_v6 = vsel %vm184_vm3, %v171_v0, %v174_v1  ;;  %v196_v7 = vsel %vm184_vm3, %v174_v1, %v177_v2  ;;  %v193_v9 = vsel %vm187_vm4, %v180_v3, 920167782 }
 0x12b   :  { %v197_v10 = vsel %vm187_vm4, %v183_v4, 1326507024  ;;  %v194_v11 = vsel %vm186_vm5, %v177_v2, %v193_v9  ;;  %v188_v14 = vsel %vm184_vm3, %v168_v8, %v171_v0  ;;  %v190_v15 = vsel %vm186_vm5, %v174_v1, %v189_v5 }
 0x12c   :  { %v198_v12 = vsel %vm186_vm5, %v180_v3, %v197_v10  ;;  %v195_v16 = vsel %vm185_vm6, %v192_v6, %v194_v11  ;;  %v191_v22 = vsel %vm185_vm6, %v188_v14, %v190_v15 }
 0x12d   :  { %v199_v17 = vsel %vm185_vm6, %v196_v7, %v198_v12  ;;  %v727_v20 = vmul.u32.u64.low %v200_v13, %v195_v16  ;;  %v728_v21 = vmul.u32.u64.high %v200_v13, %v195_v16, %v727_v20  ;;  %v207_v24 = vmul.u32 %v200_v13, %v191_v22 }
 0x12e   :  { %v724_v18 = vmul.u32.u64.low %v200_v13, %v199_v17  ;;  %v725_v19 = vmul.u32.u64.high %v200_v13, %v199_v17, %v724_v18 }
 0x12f   :  { %v210_v23 = vadd.s32 1, %v728_v21 }
 0x130   :  { %vm209_vm7 = vc.u32 %v725_v19, %v727_v20  ;;  %v208_v37 = vadd.s32 %v727_v20, %v725_v19 }
 0x131   :  { %v211_v25 = vsel %vm209_vm7, %v210_v23, %v728_v21 }
 0x132   :  { %v212_v26 = vadd.s32 %v211_v25, %v207_v24 }
 0x134   :  { %v213_v27 = vadd.s32 536870912, %v212_v26 }
 0x136   :  { %v214_v28 = vshrl.u32 %v213_v27, 30 }
 0x138   :  { %v215_v29 = vshll.u32 %v214_v28, 30  ;;  %v238_v52 = vsub.s32 4, %v214_v28 }
 0x13a   :  { %v216_v30 = vsub.s32 %v212_v26, %v215_v29  ;;  %v239_v54 = vsel %vm154_vm9, %v238_v52, %v214_v28 }
 0x13b   :  { %v241_v55 = vsel %vm153_vm10, 0, %v239_v54 }
 0x13c   :  { %v218_v31 = vsub.s32 0, %v216_v30  ;;  %v245_v56 = vand.u32 3, %v241_v55 }
 0x13e   :  { %v384_v32 = vmin.u32 %v218_v31, %v216_v30  ;;  %vm250_vm11 = vcmp.eq.s32.totalorder %v245_v56, 2  ;;  %vm247_vm12 = vcmp.eq.s32.totalorder %v245_v56, 0  ;;  %vm246_vm13 = vcmp.lt.s32.totalorder %v245_v56, 2 }
 0x140   :  { %v220_v33 = vclz %v384_v32 }
 0x142   :  { %v385_v34 = vadd.s32 4294967294, %v220_v33 }
 0x144   :  { %vm386_vm8 = vcmp.lt.s32.totalorder %v385_v34, 0 }
 0x145   :  { %v223_v36 = vsel %vm386_vm8, 0, %v385_v34 }
 0x146   :  { %v224_v38 = vsub.s32 32, %v223_v36  ;;  %v228_v39 = vsub.s32 4294967266, %v223_v36  ;;  %v225_v40 = vshll.u32 %v216_v30, %v223_v36 }
 0x148   :  { %v226_v42 = vshrl.u32 %v208_v37, %v224_v38  ;;  %v229_v43 = vadd.s32 127, %v228_v39 }
 0x14a   :  { %v227_v44 = vor.u32 %v226_v42, %v225_v40  ;;  %v230_v45 = vshll.u32 %v229_v43, 23 }
 0x14c   :  { %v231_v46 = vor.u32 4788187, %v230_v45  ;;  %v234_v48 = vcvt.s32.f32 %v227_v44 }
 0x14e   :  { %v232_v47 = vand.u32 2147483647, %v231_v46 }
 0x150   :  { %v235_v49 = vmul.f32 %v234_v48, %v232_v47 }
 0x152   :  { %v236_v50 = vxor.u32 2147483648, %v235_v49 }
 0x154   :  { %v237_v51 = vsel %vm154_vm9, %v236_v50, %v235_v49 }
 0x155   :  { %v240_v53 = vsel %vm153_vm10, %v718_v35, %v237_v51 }
 0x156   :  { %505 = vcosq.f32 %v240_v53 }
 0x157   :  { %507 = vsinq.f32 %v240_v53 }
 0x160   :  { %v506_v57 = vpop.eup %505 }
 0x161   :  { %v508_v58 = vpop.eup %507  ;;  %v251_v59 = vxor.u32 2147483648, %v506_v57 }
 0x162   :  { %v248_v60 = vxor.u32 2147483648, %v508_v58 }
 0x163   :  { %v252_v61 = vsel %vm250_vm11, %v251_v59, %v508_v58 }
 0x164   :  { %v249_v62 = vsel %vm247_vm12, %v506_v57, %v248_v60 }
 0x165   :  { %v253_v41 = vsel %vm246_vm13, %v249_v62, %v252_v61 }
 0x166   :  { %v254_v63 = vsel %vm244_vm14, nan, %v253_v41 }
 0x167   :  { %v255_v0 = vmul.f32 0.17677669, %v254_v63 }
 0x169   :  { %453 = vmatmul.mubr.f32.vlgmr.msra.gmra.mrb[0].mxu1 %v255_v0  ;;  %256 = vst [vmem:[#allocation10] sm:$0xff] %v255_v0 }
 0x16a   :  { %586 = shalt.err (!%p583_p0)
}
 0x16b   :  { %s587_s9 = scalar_lea.hbm %s768_s5, 128 }
 0x16c   :  { %p588_p1 = scmp.ne.s32.totalorder %s768_s5, %s587_s9  ;;  %p591_p2 = scmp.lt.u32.totalorder %s587_s9, %s768_s5 }
 0x16e   :  { %p593_p3 = pnand %p591_p2, %p588_p1 }
 0x170   :  { %596 = shalt.err (!%p593_p3)
}
 0x171   :  { %370 = dma.vmem_to_hbm [thread:$0]  %s368_s29, 128, %s768_s5, [#allocation11]  }
 0x172   :  { %s642_s16 = smov [#allocation9]  }
 0x173   :  { %s357_s17 = sshll.u32 %s642_s16, 4  ;;  %s358_s17 = int_to_ptr.vmem [resolvable:$true] %s357_s17 }
 0x174   :  { %s597_s1 = scalar_lea.vmem %s358_s17, 128  ;;  %p602_p5 = scmp.lt.s32.totalorder %s358_s17, %s358_s17 }
 0x175   :  { %p598_p4 = scmp.ne.s32.totalorder %s358_s17, %s597_s1  ;;  %p603_p6 = scmp.lt.s32.totalorder %s597_s1, %s597_s1 }
 0x177   :  { %p604_p7 = por %p603_p6, %p602_p5 }
 0x179   :  { %p605_p8 = pnand %p604_p7, %p598_p4 }
 0x23c   :  { %v340_v35 = vpop.f32.mrb[0].mxu1 }
 0x23d   :  { %350 = vst [vmem:[#allocation9] sm:$0xff] %v340_v35  ;;  %v454_v1 = vpop.f32.mrb[1].mxu1 }
 0x23e   :  { %608 = shalt.err (!%p605_p8)
}
 0x23f   :  { %s609_s20 = scalar_lea.hbm %s767_s4, 128 }
 0x240   :  { %p610_p9 = scmp.ne.s32.totalorder %s767_s4, %s609_s20  ;;  %p613_p10 = scmp.lt.u32.totalorder %s609_s20, %s767_s4 }
 0x242   :  { %p615_p11 = pnand %p613_p10, %p610_p9 }
 0x244   :  { %618 = shalt.err (!%p615_p11)
}
 0x245   :  { %360 = dma.vmem_to_hbm [thread:$0]  %s358_s17, 128, %s767_s4, [#allocation5]  }
 0x246   :  { %623 = dma.done.wait [#allocation5], 128  }
 0x247   :  { %624 = vsyncadd [#allocation5], 4294967168 }
 0x248   :  { %625 = dma.done.wait [#allocation11], 128  }
 0x249   :  { %626 = vsyncadd [#allocation11], 4294967168 }
 0x24a   :  { %377 = vsyncpa [#allocation4], 1 }
 0x24b   :  { %378 = vsyncpa [#allocation7], 1 }
 0x24c   :  { %379 = vsyncpa [#allocation5], 1 }
 0x24d   :  { %380 = vsyncpa [#allocation11], 1 }

</bundles_post_ra>
